<compile_context>
chip_gen: v5e
topology: v5e:2x2
jax: 0.10.0
libtpu: 0.0.40
codegen_flags: <defaults>
</compile_context>

<pallas_src>
import functools

import jax
import jax.numpy as jnp
from jax.experimental import pallas as pl
from jax.experimental.pallas import tpu as pltpu


def _focus_conv_kernel(x_ref, w_ref, b_ref, o_ref):
    """out(C_out, tm) = SiLU( W(C_out, 4C) @ X(4C, tm) + bias ), f32 accumulate."""
    acc = jnp.dot(w_ref[...], x_ref[...], preferred_element_type=jnp.float32)
    y = acc + b_ref[...]                                    # folded BN bias (f32)
    o_ref[...] = (y * jax.nn.sigmoid(y)).astype(o_ref.dtype)   # SiLU in f32


@functools.partial(jax.jit, static_argnames=("eps", "tile_m", "act_dtype"))
def focus_forward(x, conv_w, bn_gamma, bn_beta, bn_mean, bn_var, eps=1e-5,
                  tile_m=8192, act_dtype=jnp.bfloat16):
    """Focus.forward for ksize=1, stride=1 (inference BatchNorm).

    x:       (N, C, H, W)  float32, NCHW (PyTorch convention)
    conv_w:  (C_out, 4*C, 1, 1)
    bn_*:    (C_out,)
    returns: (N, C_out, H//2, W//2) in `act_dtype`
    """
    N, C, H, W = x.shape
    C_out = conv_w.shape[0]
    Hh, Wh = H // 2, W // 2
    M = Hh * Wh
    K = 4 * C

    # --- space-to-depth: one fused (N, 4C, M) bf16 tensor -------------------
    # Quadrant/concat order (tl, bl, tr, br) matches the torch Focus module.
    # TODO(synk): the stride-2 H/W gather is left to a single XLA fusion pass
    # (a lane-strided deinterleave is not expressible as a rectangular
    # BlockSpec nor as an efficient minor-axis-strided DMA); moving it fully
    # in-kernel would need a lane-permute gather on VMEM data.
    tl = x[:, :, 0::2, 0::2]
    bl = x[:, :, 1::2, 0::2]
    tr = x[:, :, 0::2, 1::2]
    br = x[:, :, 1::2, 1::2]
    xf = (jnp.concatenate((tl, bl, tr, br), axis=1)
          .reshape(N, K, M)
          .astype(act_dtype))

    # --- fold BatchNorm (running stats) into one weight matrix + bias -------
    scale = bn_gamma / jnp.sqrt(bn_var + eps)                       # (C_out,)
    bias = (bn_beta - bn_mean * scale).astype(jnp.float32)          # (C_out,)
    w = (conv_w.reshape(C_out, K) * scale[:, None]).astype(act_dtype)

    # Pad C_out to a multiple of 8 so epilogue stores are sublane-aligned
    # (matters on v5e's single vst slot); no-op for typical channel counts.
    C_pad = ((C_out + 7) // 8) * 8
    if C_pad != C_out:
        w = jnp.concatenate([w, jnp.zeros((C_pad - C_out, K), w.dtype)], axis=0)
        bias = jnp.concatenate([bias, jnp.zeros((C_pad - C_out,), bias.dtype)])
    bias = bias.reshape(C_pad, 1)

    # --- tiling --------------------------------------------------------------
    # TODO(synk): for feature maps with M < 128 (tiny images) the output lane
    # width is sub-128 and stores are masked; folding N into the lane axis
    # would fix it but needs a (4C, N*M) layout + output transpose.
    if M <= tile_m:
        tm = M                                    # full dim (always legal)
        if N == 1 and M >= 256:
            # Split M into >= 2 lane-aligned blocks so the "parallel" grid can
            # shard across both TensorCores on v7x even for a single image.
            tm = (((M + 1) // 2 + 127) // 128) * 128
    else:
        tm = max(128, (tile_m // 128) * 128)      # big lane-aligned tile
    grid = (N, pl.cdiv(M, tm))                    # tail block masked by Pallas

    x_spec = pl.BlockSpec((None, K, tm), lambda n, m: (n, 0, m))
    w_spec = pl.BlockSpec((C_pad, K), lambda n, m: (0, 0))
    b_spec = pl.BlockSpec((C_pad, 1), lambda n, m: (0, 0))
    o_spec = pl.BlockSpec((None, C_pad, tm), lambda n, m: (n, 0, m))

    out = pl.pallas_call(
        _focus_conv_kernel,
        out_shape=jax.ShapeDtypeStruct((N, C_pad, M), act_dtype),
        grid=grid,
        in_specs=[x_spec, w_spec, b_spec],
        out_specs=o_spec,
        compiler_params=pltpu.CompilerParams(
            dimension_semantics=("parallel", "parallel")),
    )(xf, w, bias)

    if C_pad != C_out:
        out = out[:, :C_out, :]
    # (N, C_out, M) -> (N, C_out, H/2, W/2): plain reshape, no transpose.
    return out.reshape(N, C_out, Hh, Wh)


def focus_reference(x, conv_w, bn_gamma, bn_beta, bn_mean, bn_var, eps=1e-5):
    """Pure-JAX f32 reference of the same forward (for sanity check)."""
    tl = x[..., ::2, ::2]
    tr = x[..., ::2, 1::2]
    bl = x[..., 1::2, ::2]
    br = x[..., 1::2, 1::2]
    xf = jnp.concatenate((tl, bl, tr, br), axis=1)
    y = jnp.einsum('nchw,oc->nohw', xf, conv_w.reshape(conv_w.shape[0], -1))
    scale = bn_gamma / jnp.sqrt(bn_var + eps)
    bias = bn_beta - bn_mean * scale
    y = y * scale[None, :, None, None] + bias[None, :, None, None]
    return y * jax.nn.sigmoid(y)


if __name__ == "__main__":
    key = jax.random.PRNGKey(0)
    k_x, k_w, k_g, k_b, k_m, k_v = jax.random.split(key, 6)

    N, C, H, W = 2, 4, 16, 16
    C_out = 8

    x = jax.random.normal(k_x, (N, C, H, W), dtype=jnp.float32)
    conv_w = jax.random.normal(k_w, (C_out, 4 * C, 1, 1), dtype=jnp.float32) * 0.1
    bn_gamma = 1.0 + 0.1 * jax.random.normal(k_g, (C_out,), dtype=jnp.float32)
    bn_beta = 0.1 * jax.random.normal(k_b, (C_out,), dtype=jnp.float32)
    bn_mean = 0.05 * jax.random.normal(k_m, (C_out,), dtype=jnp.float32)
    bn_var = 1.0 + 0.1 * jax.random.uniform(k_v, (C_out,), dtype=jnp.float32)

    out = focus_forward(x, conv_w, bn_gamma, bn_beta, bn_mean, bn_var)
    out = jax.block_until_ready(out)

    ref = focus_reference(x, conv_w, bn_gamma, bn_beta, bn_mean, bn_var)
    assert out.shape == (N, C_out, H // 2, W // 2), out.shape
    # bf16 activations/weights (f32 accumulate) -> relaxed tolerance vs f32 ref.
    err = float(jnp.max(jnp.abs(out.astype(jnp.float32) - ref)))
    assert jnp.allclose(out.astype(jnp.float32), ref, atol=3e-2, rtol=3e-2), err

    print("KERNEL_OK")
</pallas_src>

<mosaic_0001>
module attributes {stable_mosaic.version = 11 : i64} {
  func.func @_focus_conv_kernel(%arg0: i32, %arg1: i32, %arg2: memref<1x16x64xbf16, #tpu.memory_space<vmem>>, %arg3: memref<8x16xbf16, #tpu.memory_space<vmem>>, %arg4: memref<8x1xf32, #tpu.memory_space<vmem>>, %arg5: memref<1x8x64xbf16, #tpu.memory_space<vmem>>) attributes {dimension_semantics = [#tpu.dimension_semantics<parallel>, #tpu.dimension_semantics<parallel>], iteration_bounds = array<i64: 2, 1>, scalar_prefetch = 0 : i64, scratch_operands = 0 : i64, tpu.core_type = #tpu.core_type<tc>, window_params = [{transform_indices = @transform_0, window_bounds = array<i64: 1, 16, 64>}, {pipeline_mode = #tpu.pipeline_mode<synchronous>, transform_indices = @transform_1, window_bounds = array<i64: 8, 16>}, {pipeline_mode = #tpu.pipeline_mode<synchronous>, transform_indices = @transform_2, window_bounds = array<i64: 8, 1>}, {transform_indices = @transform_3, window_bounds = array<i64: 1, 8, 64>}]} {
    %c0 = arith.constant 0 : index
    %c0_0 = arith.constant 0 : index
    %0 = vector.load %arg3[%c0, %c0_0] : memref<8x16xbf16, #tpu.memory_space<vmem>>, vector<8x16xbf16>
    %c0_1 = arith.constant 0 : index
    %c0_2 = arith.constant 0 : index
    %c0_3 = arith.constant 0 : index
    %1 = vector.load %arg2[%c0_1, %c0_2, %c0_3] : memref<1x16x64xbf16, #tpu.memory_space<vmem>>, vector<1x16x64xbf16>
    %2 = vector.shape_cast %1 : vector<1x16x64xbf16> to vector<16x64xbf16>
    %cst = arith.constant dense<0.000000e+00> : vector<8x64xf32>
    %3 = tpu.matmul %0, %2, %cst {dimension_numbers = #tpu.dot_dimension_numbers<[1], [0], [0], [1], [0, 0, 1, 1], [], []>} : vector<8x16xbf16>, vector<16x64xbf16>, vector<8x64xf32> -> vector<8x64xf32>
    %c0_4 = arith.constant 0 : index
    %c0_5 = arith.constant 0 : index
    %4 = vector.load %arg4[%c0_4, %c0_5] : memref<8x1xf32, #tpu.memory_space<vmem>>, vector<8x1xf32>
    %5 = vector.broadcast %4 : vector<8x1xf32> to vector<8x64xf32>
    %6 = arith.addf %3, %5 : vector<8x64xf32>
    %7 = arith.negf %6 : vector<8x64xf32>
    %8 = math.exp %7 : vector<8x64xf32>
    %cst_6 = arith.constant 1.000000e+00 : f32
    %9 = vector.broadcast %cst_6 : f32 to vector<8x64xf32>
    %10 = arith.addf %9, %8 : vector<8x64xf32>
    %11 = arith.divf %9, %10 : vector<8x64xf32>
    %12 = arith.mulf %6, %11 : vector<8x64xf32>
    %13 = arith.truncf %12 : vector<8x64xf32> to vector<8x64xbf16>
    %c0_7 = arith.constant 0 : index
    %c0_8 = arith.constant 0 : index
    %c0_9 = arith.constant 0 : index
    %14 = vector.load %arg5[%c0_7, %c0_8, %c0_9] : memref<1x8x64xbf16, #tpu.memory_space<vmem>>, vector<1x8x64xbf16>
    %15 = vector.shape_cast %14 : vector<1x8x64xbf16> to vector<8x64xbf16>
    %16 = vector.shape_cast %13 : vector<8x64xbf16> to vector<1x8x64xbf16>
    tpu.vector_store %arg5[%c0_7, %c0_8, %c0_9], %16 {strides = array<i32>} : memref<1x8x64xbf16, #tpu.memory_space<vmem>>, vector<1x8x64xbf16>,
    return
  }
  func.func @transform_0(%arg0: i32, %arg1: i32) -> (i32, i32, i32) {
    %c0_i32 = arith.constant 0 : i32
    %c0_i32_0 = arith.constant 0 : i32
    return %arg0, %c0_i32, %arg1 : i32, i32, i32
  }
  func.func @transform_1(%arg0: i32, %arg1: i32) -> (i32, i32) {
    %c0_i32 = arith.constant 0 : i32
    %c0_i32_0 = arith.constant 0 : i32
    %c0_i32_1 = arith.constant 0 : i32
    return %c0_i32, %c0_i32_0 : i32, i32
  }
  func.func @transform_2(%arg0: i32, %arg1: i32) -> (i32, i32) {
    %c0_i32 = arith.constant 0 : i32
    %c0_i32_0 = arith.constant 0 : i32
    %c0_i32_1 = arith.constant 0 : i32
    return %c0_i32, %c0_i32_0 : i32, i32
  }
  func.func @transform_3(%arg0: i32, %arg1: i32) -> (i32, i32, i32) {
    %c0_i32 = arith.constant 0 : i32
    %c0_i32_0 = arith.constant 0 : i32
    return %arg0, %c0_i32, %arg1 : i32, i32, i32
  }
}

</mosaic_0001>

<bundles_post_ra>
// kernel: focus_forward.1
= control target key start
LH: loop header
LB: loop body
LE: loop exit
PB: predicated region body
PF: predicated region fallthrough
CT: control target
= control target key end

     0   :  { %s426_s12 = smov 0   ;;  %s428_s13 = smov 0   ;;  %s469_s0 = inlined_call_operand.vmem [shape: bf16[2,16,64], index: 0, kind: input, shape index: {}]   ;;  %s470_s1 = inlined_call_operand.vmem [shape: bf16[8,16], index: 1, kind: input, shape index: {}]   ;;  %s471_s2 = inlined_call_operand.vmem [shape: f32[8,1], index: 2, kind: input, shape index: {}]   ;;  %s472_s3 = inlined_call_operand.vmem [shape: bf16[2,8,64], index: 3, kind: output, shape index: {}]  }
   0x1   :  { %s430_s14 = smov 0  }
   0x2 LB: > { %s25_s15 = sadd.s32 1, %s399_s13  ;;  %p337_p0 = scmp.ge.s32.totalorder %s403_s14, 1  ;;  %s403_s14 = sphi %s430_s14, %s13_s14   ;;  %s399_s13 = sphi %s428_s13, %s474_s13   ;;  %s395_s12 = sphi %s426_s12, %s473_s12  }
   0x3   : > { %p27_p1 = scmp.ge.s32.totalorder %s25_s15, 2  ;;  %p156_p2 = scmp.lt.s32.totalorder %s403_s14, 3 }
   0x5   : > { %s476_s15 = smov (%p27_p1, %s25_s15), 0  ;;  %p157_p3 = pnand %p337_p0, %p156_p2 }
   0x6   : > { %p185_p4 = scmp.lt.s32.totalorder (!%p157_p3), %s395_s12, 1 }
   0x7   : > { %160 = sbr.rel (%p157_p3) target bundleno = 180 (0xb4), region = 32 }
   0xc   : > { %v204_v0 = vld [vmem:[%s471_s2] sm:$0xff]  ;;  %v405_v1 = vmov 0   ;;  %s478_s12 = smov (!%p185_p4, %s395_s12), 1  ;;  %vm216_vm0 = vcmask 130048   ;;  %vm254_vm5 = vcmask 519168  }
   0xd   : > { %376 = vset.pattern.permute.xlu0 %v405_v1  ;;  %s349_s18 = sshll.u32 %s478_s12, 3  ;;  %v201_v3 = vld [vmem:[%s470_s1] sm:$0xf]  ;;  %s340_s24 = sshll.u32 %s478_s12, 2 }
   0xe   : > { %207 = vperm.xlu0 %376, %v204_v0   ;;  %s192_s21 = scalar_lea.vmem %s469_s0, %s349_s18  ;;  %s199_s27 = scalar_lea.vmem %s472_s3, %s340_s24 }
   0xf   : > { %v350_v2 = vld [vmem:[%s192_s21] sm:$0xff] }
  0x10   : > { %227 = vmatpush.bf16.msra.mxu0 %v350_v2 }
  0x13   : > { %345 = vmatmul.msk.bf16.vlgmr.msra.gmra.mxu0 %vm216_vm0, %v201_v3 }
  0x80   : > { %v208_v4 = vpop.permute.xlu0 %207 }
  0x90   : > { %v229_v5 = vpop.f32.mrf.mxu0 }
  0x91   : > { %v230_v6 = vadd.f32 %v229_v5, %v208_v4 }
  0x93   : > { %v346_v7 = vmul.f32 -1.442695, %v230_v6 }
  0x95   : > { %377 = vpow2.f32 %v346_v7 }
  0x98   : > { %v231_v8 = vpop.f32.mrf.mxu0 }
  0x9b   : > { %v378_v9 = vpop.eup %377 }
  0x9c   : > { %v236_v10 = vadd.f32 1.0, %v378_v9 }
  0x9e   : > { %379 = vrcp.f32 %v236_v10  ;;  %v248_v14 = vand.u32 2147483648, %v236_v10  ;;  %v246_v16 = vand.u32 2147483647, %v236_v10  ;;  %vm242_vm2 = vweird.f32 %v236_v10 }
  0xa0   : > { %v249_v18 = vor.u32 1.1754944e-38, %v248_v14  ;;  %vm247_vm4 = vcmp.eq.f32.partialorder %v246_v16, 8.507059e+37 }
  0xa4   : > { %v380_v11 = vpop.eup %379 }
  0xa5   : > { %v238_v12 = vmul.f32 %v380_v11, %v236_v10  ;;  %vm243_vm1 = vweird.f32 %v380_v11 }
  0xa6   : > { %vm244_vm3 = vmor %vm242_vm2, %vm243_vm1 }
  0xa7   : > { %v239_v13 = vsub.f32 1.0, %v238_v12 }
  0xa9   : > { %v240_v15 = vmul.f32 %v380_v11, %v239_v13 }
  0xab   : > { %v241_v17 = vadd.f32 %v380_v11, %v240_v15 }
  0xad   : > { %v245_v19 = vsel %vm244_vm3, %v380_v11, %v241_v17 }
  0xae   : > { %v250_v20 = vsel %vm247_vm4, %v249_v18, %v245_v19 }
  0xaf   : > { %v252_v21 = vmul.f32 %v250_v20, %v230_v6 }
  0xb1   : > { %v253_v22 = vpack.c.bf16 %v252_v21, %v252_v21 }
  0xb3   : > { %255 = vst.msk [vmem:[%s199_s27] sm:$0xf] %vm254_vm5, %v253_v22 }
  0xb4 PF: > { %s13_s14 = sadd.s32 1, %s403_s14   ;;  %s473_s12 = smov %s399_s13 }
  0xb5   : > { %p10_p5 = scmp.ge.s32.totalorder %s13_s14, 4   ;;  %s474_s13 = smov %s476_s15 }
  0xb7   :  { %12 = sbr.rel (!%p10_p5) target bundleno = 2 (0x2), region = 62 }

</bundles_post_ra>
